<compile_context>
chip_gen: v7x
topology: tpu7x:2x2x1
jax: 0.10.0
libtpu: 0.0.40
codegen_flags: <defaults>
</compile_context>

<pallas_src>
import numpy as np
import jax
import jax.numpy as jnp
from jax import lax
from jax.experimental import pallas as pl
from jax.experimental.pallas import tpu as pltpu


_LANE = 128
_SMALL_N_UNROLL = 32  # fully unroll the pairwise j-loop at trace time up to this N


def _cdiv(a, b):
    return -(-a // b)


def _vmem_limit_bytes():
    """Generation-aware VMEM budget (v5e/v6e: 128 MiB physical, v7x: 64 MiB)."""
    cap = None
    try:
        cap = int(pltpu.get_tpu_info().vmem_capacity_bytes)
    except Exception:
        cap = None
    if not cap:
        cap = 64 << 20
    return int(max(16 << 20, min(cap // 2, 64 << 20)))


def _choose_tiles(r1, n, itemsize, vmem_limit):
    """Pick (block_r1, chunk_r1, grid) for array (n, r1, 128)."""
    # Inner compute chunk along the row-sublane axis: keep the three f32
    # (N, chunk, 128) slabs (z, cnt, ssum) roughly inside the 64-vreg file.
    chunk = max(1, 128 // n)
    if chunk >= 8:
        chunk = (chunk // 8) * 8          # sublane-tile aligned chunk offsets
    chunk = min(chunk, r1)

    # Block: ~1-4 MiB of input per grid step (hides the ~0.35us/step overhead
    # and reaches HBM roofline), never larger than the data itself.
    target = min(4 << 20, vmem_limit // 8)
    block = max(chunk, target // (n * _LANE * itemsize))
    block = min(block, r1)
    if block < r1:
        block = max(chunk, (block // chunk) * chunk)

    # Megacore: prefer >= 8 parallel grid steps while blocks stay >= ~256 KiB.
    min_block_bytes = 256 << 10
    for steps in (8, 4, 2):
        cand = _cdiv(_cdiv(r1, steps), chunk) * chunk
        cand = max(chunk, min(cand, r1))
        if cand < block and cand * n * _LANE * itemsize >= min_block_bytes:
            block = cand
            break
    grid = _cdiv(r1, block)

    # Prefer an even step count (v7x shards the parallel grid over 2 TCs).
    if grid > 2 and grid % 2 == 1:
        cand = _cdiv(_cdiv(r1, grid + 1), chunk) * chunk
        cand = max(chunk, min(cand, r1))
        if _cdiv(r1, cand) % 2 == 0:
            block, grid = cand, _cdiv(r1, cand)

    return int(block), int(chunk), int(grid)


def _make_sparsemax_kernel(n, block_r1, chunk_r1):
    full_chunks = block_r1 // chunk_r1
    rem = block_r1 - full_chunks * chunk_r1

    def kernel(x_ref, o_ref):
        # x_ref / o_ref: (N, block_r1, 128) tiles; N leading (non-minor).

        def do_chunk(r0, size):
            z = x_ref[:, pl.ds(r0, size), :].astype(jnp.float32)   # (N, size, 128)
            zeros = jnp.zeros_like(z)
            cnt, ssum = zeros, zeros

            if n <= _SMALL_N_UNROLL:
                # Static unrolled j-loop: whole-vreg compares/selects, f32 acc.
                # TODO(synk): for bf16 inputs on v6e/v7x keep z in bf16 for the
                # compare/select and only accumulate cnt/ssum in f32.
                for j in range(n):
                    zj = z[j:j + 1]                       # (1, size, 128): vreg reuse
                    ge = zj >= z                          # (N, size, 128) bool
                    cnt = cnt + jnp.where(ge, 1.0, 0.0)
                    ssum = ssum + jnp.where(ge, zj, 0.0)
            else:
                # Large N: rolled pairwise loop, zj re-loaded from VMEM per j.
                # TODO(synk): for very large N (>~256) switch to tau-bisection
                # (~30 masked-sum passes) instead of this O(N^2) pairwise pass.
                def body(j, carry):
                    c, s = carry
                    zj = x_ref[pl.ds(j, 1), pl.ds(r0, size), :].astype(jnp.float32)
                    ge = zj >= z
                    return (c + jnp.where(ge, 1.0, 0.0),
                            s + jnp.where(ge, zj, 0.0))

                unroll = 8 if (n % 8 == 0) else None
                cnt, ssum = lax.fori_loop(0, n, body, (cnt, ssum), unroll=unroll)

            supp = cnt * z > ssum - 1.0                   # (N, size, 128) bool
            # Reductions over the leading N axis: plain whole-vreg VALU adds.
            k_z = jnp.sum(jnp.where(supp, 1.0, 0.0), axis=0, keepdims=True)
            s_z = jnp.sum(jnp.where(supp, z, 0.0), axis=0, keepdims=True)
            tau = (s_z - 1.0) / k_z                       # exact divide (tolerance)
            out = jnp.maximum(z - tau, 0.0)
            o_ref[:, pl.ds(r0, size), :] = out.astype(o_ref.dtype)

        if full_chunks == 1:
            do_chunk(0, chunk_r1)
        elif full_chunks > 1:
            def loop_body(c, carry):
                do_chunk(pl.multiple_of(c * chunk_r1, chunk_r1), chunk_r1)
                return carry
            lax.fori_loop(0, full_chunks, loop_body, 0)
        if rem:
            do_chunk(full_chunks * chunk_r1, rem)

    return kernel


def sparsemax_pallas(x, dim=0):
    dim = dim % x.ndim
    n = x.shape[dim]

    # Put the sparsemax axis in front.  Zero-cost (pure reshape of contiguous
    # data) for the module default dim=0; one transpose otherwise.
    # TODO(synk): for dim != 0 grid the original array directly (no transpose).
    xm = x if dim == 0 else jnp.moveaxis(x, dim, 0)
    lead_shape = xm.shape[1:]
    rows = int(np.prod(lead_shape)) if lead_shape else 1

    rows_pad = _cdiv(rows, _LANE) * _LANE
    x2 = xm.reshape(n, rows)
    if rows_pad != rows:
        # Only when the flattened row count is not lane-aligned; padded lanes
        # are independent of real ones and sliced off below.
        x2 = jnp.pad(x2, ((0, 0), (0, rows_pad - rows)))
    r1 = rows_pad // _LANE
    x3 = x2.reshape(n, r1, _LANE)                         # rows occupy last 2 dims

    itemsize = jnp.dtype(x.dtype).itemsize
    vmem_limit = _vmem_limit_bytes()
    block_r1, chunk_r1, grid = _choose_tiles(r1, n, itemsize, vmem_limit)

    out = pl.pallas_call(
        _make_sparsemax_kernel(n, block_r1, chunk_r1),
        out_shape=jax.ShapeDtypeStruct((n, r1, _LANE), x.dtype),
        grid_spec=pltpu.PrefetchScalarGridSpec(
            num_scalar_prefetch=0,
            grid=(grid,),
            in_specs=[pl.BlockSpec((n, block_r1, _LANE), lambda i: (0, i, 0))],
            out_specs=pl.BlockSpec((n, block_r1, _LANE), lambda i: (0, i, 0)),
        ),
        compiler_params=pltpu.CompilerParams(
            dimension_semantics=("parallel",),
            vmem_limit_bytes=int(vmem_limit),
        ),
        cost_estimate=pl.CostEstimate(
            flops=int(5 * rows_pad * n * n + 10 * rows_pad * n),
            transcendentals=0,
            bytes_accessed=int(2 * n * rows_pad * itemsize),
        ),
    )(x3)

    out = out.reshape(n, rows_pad)[:, :rows].reshape((n,) + lead_shape)
    return out if dim == 0 else jnp.moveaxis(out, 0, dim)


class Sparsemax:
    """JAX/Pallas equivalent of the PyTorch Sparsemax module (forward only)."""
    # TODO(synk): backward pass (SparsemaxFunction.backward) not implemented.

    def __init__(self, dim=0):
        self.dim = dim

    def __call__(self, x):
        return sparsemax_pallas(x, self.dim)


def _sparsemax_ref(z, dim=0):
    """Pure-JAX reference mirroring the PyTorch sort/cumsum/gather formulation."""
    dim = dim % z.ndim
    sorted_z = -jnp.sort(-z, axis=dim)
    z_sum = jnp.cumsum(sorted_z, axis=dim) - 1.0
    n = z.shape[dim]
    k_shape = [1] * z.ndim
    k_shape[dim] = n
    k = jnp.arange(1, n + 1, dtype=z.dtype).reshape(k_shape)
    support = k * sorted_z > z_sum
    k_z_idx = jnp.sum(support, axis=dim, keepdims=True)
    tau = jnp.take_along_axis(z_sum, k_z_idx - 1, axis=dim) / k_z_idx.astype(z.dtype)
    return jnp.clip(z - tau, 0.0, None)


if __name__ == "__main__":
    key = jax.random.PRNGKey(0)
    x = jax.random.normal(key, (2, 4, 16, 16), dtype=jnp.float32)

    # Module default: dim=0
    sm0 = Sparsemax(dim=0)
    y0 = jax.block_until_ready(sm0(x))
    ref0 = _sparsemax_ref(x, dim=0)

    # Non-trivial axis (channels, dim=1)
    sm1 = Sparsemax(dim=1)
    y1 = jax.block_until_ready(sm1(x))
    ref1 = _sparsemax_ref(x, dim=1)

    # Odd, non-lane-aligned shape exercising the padding / reshape-back path.
    x_odd = jax.random.normal(jax.random.PRNGKey(0), (6, 5, 7), dtype=jnp.float32)
    y2 = jax.block_until_ready(Sparsemax(dim=2)(x_odd))
    ref2 = _sparsemax_ref(x_odd, dim=2)

    assert y0.shape == x.shape and y0.dtype == x.dtype
    np.testing.assert_allclose(np.asarray(y0), np.asarray(ref0), atol=1e-5, rtol=1e-5)
    np.testing.assert_allclose(np.asarray(y1), np.asarray(ref1), atol=1e-5, rtol=1e-5)
    np.testing.assert_allclose(np.asarray(y2), np.asarray(ref2), atol=1e-5, rtol=1e-5)
    # sparsemax outputs form a probability simplex along the reduced dim
    np.testing.assert_allclose(np.asarray(jnp.sum(y1, axis=1)), 1.0, atol=1e-5)
    np.testing.assert_allclose(np.asarray(jnp.sum(y2, axis=2)), 1.0, atol=1e-5)

    print("KERNEL_OK")
</pallas_src>

<mosaic_0001>
module attributes {stable_mosaic.version = 11 : i64} {
  func.func @kernel(%arg0: i32, %arg1: memref<2x8x128xf32, #tpu.memory_space<vmem>>, %arg2: memref<2x8x128xf32, #tpu.memory_space<vmem>>) attributes {dimension_semantics = [#tpu.dimension_semantics<parallel>], iteration_bounds = array<i64: 1>, scalar_prefetch = 0 : i64, scratch_operands = 0 : i64, tpu.core_type = #tpu.core_type<tc>, window_params = [{transform_indices = @transform_0, window_bounds = array<i64: 2, 8, 128>}, {transform_indices = @transform_1, window_bounds = array<i64: 2, 8, 128>}]} {
    %c0 = arith.constant 0 : index
    %c0_0 = arith.constant 0 : index
    %c0_1 = arith.constant 0 : index
    %0 = vector.load %arg1[%c0, %c0_0, %c0_1] : memref<2x8x128xf32, #tpu.memory_space<vmem>>, vector<2x8x128xf32>
    %cst = arith.constant 0.000000e+00 : f32
    %1 = vector.broadcast %cst : f32 to vector<2x8x128xf32>
    %2 = vector.extract_strided_slice %0 {offsets = [0, 0, 0], sizes = [1, 8, 128], strides = [1, 1, 1]} : vector<2x8x128xf32> to vector<1x8x128xf32>
    %3 = vector.broadcast %2 : vector<1x8x128xf32> to vector<2x8x128xf32>
    %4 = arith.cmpf oge, %3, %0 : vector<2x8x128xf32>
    %cst_2 = arith.constant 1.000000e+00 : f32
    %cst_3 = arith.constant 0.000000e+00 : f32
    %5 = vector.broadcast %cst_2 : f32 to vector<2x8x128xf32>
    %6 = vector.broadcast %cst_3 : f32 to vector<2x8x128xf32>
    %7 = arith.select %4, %5, %6 : vector<2x8x128xi1>, vector<2x8x128xf32>
    %8 = arith.addf %1, %7 : vector<2x8x128xf32>
    %cst_4 = arith.constant 0.000000e+00 : f32
    %9 = vector.shape_cast %2 : vector<1x8x128xf32> to vector<1x8x128xf32>
    %10 = vector.broadcast %9 : vector<1x8x128xf32> to vector<2x8x128xf32>
    %11 = vector.broadcast %cst_4 : f32 to vector<2x8x128xf32>
    %12 = arith.select %4, %10, %11 : vector<2x8x128xi1>, vector<2x8x128xf32>
    %13 = arith.addf %1, %12 : vector<2x8x128xf32>
    %14 = vector.extract_strided_slice %0 {offsets = [1, 0, 0], sizes = [1, 8, 128], strides = [1, 1, 1]} : vector<2x8x128xf32> to vector<1x8x128xf32>
    %15 = vector.broadcast %14 : vector<1x8x128xf32> to vector<2x8x128xf32>
    %16 = arith.cmpf oge, %15, %0 : vector<2x8x128xf32>
    %cst_5 = arith.constant 1.000000e+00 : f32
    %cst_6 = arith.constant 0.000000e+00 : f32
    %17 = vector.broadcast %cst_5 : f32 to vector<2x8x128xf32>
    %18 = vector.broadcast %cst_6 : f32 to vector<2x8x128xf32>
    %19 = arith.select %16, %17, %18 : vector<2x8x128xi1>, vector<2x8x128xf32>
    %20 = arith.addf %8, %19 : vector<2x8x128xf32>
    %cst_7 = arith.constant 0.000000e+00 : f32
    %21 = vector.shape_cast %14 : vector<1x8x128xf32> to vector<1x8x128xf32>
    %22 = vector.broadcast %21 : vector<1x8x128xf32> to vector<2x8x128xf32>
    %23 = vector.broadcast %cst_7 : f32 to vector<2x8x128xf32>
    %24 = arith.select %16, %22, %23 : vector<2x8x128xi1>, vector<2x8x128xf32>
    %25 = arith.addf %13, %24 : vector<2x8x128xf32>
    %26 = arith.mulf %20, %0 : vector<2x8x128xf32>
    %cst_8 = arith.constant 1.000000e+00 : f32
    %27 = vector.broadcast %cst_8 : f32 to vector<2x8x128xf32>
    %28 = arith.subf %25, %27 : vector<2x8x128xf32>
    %29 = arith.cmpf ogt, %26, %28 : vector<2x8x128xf32>
    %cst_9 = arith.constant 1.000000e+00 : f32
    %cst_10 = arith.constant 0.000000e+00 : f32
    %30 = vector.broadcast %cst_9 : f32 to vector<2x8x128xf32>
    %31 = vector.broadcast %cst_10 : f32 to vector<2x8x128xf32>
    %32 = arith.select %29, %30, %31 : vector<2x8x128xi1>, vector<2x8x128xf32>
    %cst_11 = arith.constant dense<0.000000e+00> : vector<8x128xf32>
    %33 = vector.multi_reduction <add>, %32, %cst_11 [0] : vector<2x8x128xf32> to vector<8x128xf32>
    %34 = vector.shape_cast %33 : vector<8x128xf32> to vector<1x8x128xf32>
    %cst_12 = arith.constant 0.000000e+00 : f32
    %35 = vector.broadcast %cst_12 : f32 to vector<2x8x128xf32>
    %36 = arith.select %29, %0, %35 : vector<2x8x128xi1>, vector<2x8x128xf32>
    %cst_13 = arith.constant dense<0.000000e+00> : vector<8x128xf32>
    %37 = vector.multi_reduction <add>, %36, %cst_13 [0] : vector<2x8x128xf32> to vector<8x128xf32>
    %38 = vector.shape_cast %37 : vector<8x128xf32> to vector<1x8x128xf32>
    %cst_14 = arith.constant 1.000000e+00 : f32
    %39 = vector.broadcast %cst_14 : f32 to vector<1x8x128xf32>
    %40 = arith.subf %38, %39 : vector<1x8x128xf32>
    %41 = arith.divf %40, %34 : vector<1x8x128xf32>
    %42 = vector.broadcast %41 : vector<1x8x128xf32> to vector<2x8x128xf32>
    %43 = arith.subf %0, %42 : vector<2x8x128xf32>
    %cst_15 = arith.constant 0.000000e+00 : f32
    %44 = vector.broadcast %cst_15 : f32 to vector<2x8x128xf32>
    %45 = arith.maximumf %43, %44 : vector<2x8x128xf32>
    %c0_16 = arith.constant 0 : index
    %c0_17 = arith.constant 0 : index
    %c0_18 = arith.constant 0 : index
    %46 = vector.load %arg2[%c0_16, %c0_17, %c0_18] : memref<2x8x128xf32, #tpu.memory_space<vmem>>, vector<2x8x128xf32>
    tpu.vector_store %arg2[%c0_16, %c0_17, %c0_18], %45 {strides = array<i32>} : memref<2x8x128xf32, #tpu.memory_space<vmem>>, vector<2x8x128xf32>,
    return
  }
  func.func @transform_0(%arg0: i32) -> (i32, i32, i32) {
    %c0_i32 = arith.constant 0 : i32
    %c0_i32_0 = arith.constant 0 : i32
    %c0_i32_1 = arith.constant 0 : i32
    return %c0_i32, %arg0, %c0_i32_0 : i32, i32, i32
  }
  func.func @transform_1(%arg0: i32) -> (i32, i32, i32) {
    %c0_i32 = arith.constant 0 : i32
    %c0_i32_0 = arith.constant 0 : i32
    %c0_i32_1 = arith.constant 0 : i32
    return %c0_i32, %arg0, %c0_i32_0 : i32, i32, i32
  }
}

</mosaic_0001>

<bundles_post_ra>
// kernel: tpu_custom_call.1
= control target key start
LH: loop header
LB: loop body
LE: loop exit
PB: predicated region body
PF: predicated region fallthrough
CT: control target
= control target key end

     0   :  { %6 = vsyncpa [#allocation3], 0  ;;  %s186_s0 = inlined_call_operand.hbm [shape: f32[2,8,128], index: 0, kind: input, shape index: {}]   ;;  %s187_s1 = inlined_call_operand.hbm [shape: f32[2,8,128], index: 1, kind: output, shape index: {}]  }
   0x1   :  { %7 = vsyncpa [#allocation4], 0  ;;  %s141_s6 = smov [#allocation2]   ;;  %s93_s10 = scalar_lea.hbm %s186_s0, 256 }
   0x2   :  { %s13_s7 = sshll.u32 %s141_s6, 4  ;;  %p94_p0 = scmp.ne.s32.totalorder %s186_s0, %s93_s10  ;;  %s14_s7 = int_to_ptr.vmem [resolvable:$true] %s13_s7 }
   0x3   :  { %p97_p1 = scmp.lt.u32.totalorder %s93_s10, %s186_s0 }
   0x5   :  { %p99_p2 = pnand %p97_p1, %p94_p0 }
   0x7   :  { %102 = shalt.err (!%p99_p2)
}
   0x8   :  { %s103_s15 = scalar_lea.vmem %s14_s7, 256  ;;  %p108_p4 = scmp.lt.s32.totalorder %s14_s7, %s14_s7 }
   0x9   :  { %p104_p3 = scmp.ne.s32.totalorder %s14_s7, %s103_s15  ;;  %p109_p5 = scmp.lt.s32.totalorder %s103_s15, %s103_s15 }
   0xb   :  { %p110_p6 = por %p109_p5, %p108_p4 }
   0xd   :  { %p111_p7 = pnand %p110_p6, %p104_p3 }
   0xf   :  { %114 = shalt.err (!%p111_p7)
}
  0x10   :  { %s142_s16 = smov 128   ;;  %s143_s17 = smov 8  }
  0x11   :  { %19 = dma.hbm_to_vmem [thread:$0]  %s186_s0, 256, %s14_s7, [#allocation3], %s142_s16, %s142_s16, %s143_s17  }
  0x12   :  { %137 = dma.done.wait [#allocation3], 256  }
  0x13   :  { %138 = vsyncadd [#allocation3], 4294967040  ;;  %v23_v0 = vld [vmem:[#allocation2] sm:$0xff]  ;;  %v24_v1 = vld [vmem:[#allocation2 + $0x8] sm:$0xff]  ;;  %v144_v2 = vmov 0.0   ;;  %s145_s0 = smov [#allocation5]  }
  0x14   :  { %vm25_vm0 = vcmp.ge.f32.partialorder %v23_v0, %v23_v0  ;;  %vm26_vm1 = vcmp.ge.f32.partialorder %v23_v0, %v24_v1  ;;  %vm35_vm2 = vcmp.ge.f32.partialorder %v24_v1, %v23_v0  ;;  %vm36_vm3 = vcmp.ge.f32.partialorder %v24_v1, %v24_v1  ;;  %s71_s20 = sshll.u32 %s145_s0, 4  ;;  %s72_s20 = int_to_ptr.vmem [resolvable:$true] %s71_s20 }
  0x15   :  { %v27_v3 = vsel %vm25_vm0, 1.0, %v144_v2  ;;  %v28_v4 = vsel %vm26_vm1, 1.0, %v144_v2  ;;  %v31_v5 = vsel %vm25_vm0, %v23_v0, 0.0  ;;  %v32_v6 = vsel %vm26_vm1, %v23_v0, 0.0  ;;  %s115_s21 = scalar_lea.vmem %s72_s20, 256  ;;  %p120_p9 = scmp.lt.s32.totalorder %s72_s20, %s72_s20 }
  0x16   :  { %v37_v7 = vsel %vm35_vm2, 1.0, %v144_v2  ;;  %v38_v8 = vsel %vm36_vm3, 1.0, %v144_v2  ;;  %v41_v9 = vsel %vm35_vm2, %v24_v1, 0.0  ;;  %v42_v10 = vsel %vm36_vm3, %v24_v1, 0.0  ;;  %p116_p8 = scmp.ne.s32.totalorder %s72_s20, %s115_s21  ;;  %p121_p10 = scmp.lt.s32.totalorder %s115_s21, %s115_s21 }
  0x17   :  { %v39_v11 = vadd.f32 %v37_v7, %v27_v3  ;;  %v40_v12 = vadd.f32 %v38_v8, %v28_v4  ;;  %v43_v13 = vadd.f32 %v41_v9, %v31_v5  ;;  %v44_v14 = vadd.f32 %v42_v10, %v32_v6 }
  0x18   :  { %p122_p11 = por %p121_p10, %p120_p9 }
  0x19   :  { %v45_v15 = vmul.f32 %v39_v11, %v23_v0  ;;  %v46_v16 = vmul.f32 %v40_v12, %v24_v1  ;;  %v83_v17 = vadd.f32 -1.0, %v43_v13  ;;  %v84_v18 = vadd.f32 -1.0, %v44_v14 }
  0x1a   :  { %p123_p12 = pnand %p122_p11, %p116_p8 }
  0x1b   :  { %vm49_vm4 = vcmp.gt.f32.partialorder %v45_v15, %v83_v17  ;;  %vm50_vm5 = vcmp.gt.f32.partialorder %v46_v16, %v84_v18 }
  0x1c   :  { %v51_v19 = vsel %vm49_vm4, 1.0, %v144_v2  ;;  %v52_v20 = vsel %vm50_vm5, 1.0, %v144_v2  ;;  %v54_v22 = vsel %vm49_vm4, %v23_v0, 0.0  ;;  %v55_v23 = vsel %vm50_vm5, %v24_v1, 0.0 }
  0x1d   :  { %v53_v21 = vadd.f32 %v52_v20, %v51_v19  ;;  %v56_v24 = vadd.f32 %v55_v23, %v54_v22 }
  0x1f   :  { %91 = vrcp.f32 %v53_v21  ;;  %v85_v25 = vadd.f32 -1.0, %v56_v24 }
  0x29   :  { %v92_v26 = vpop.eup %91 }
  0x2a   :  { %v59_v27 = vmul.f32 %v92_v26, %v85_v25 }
  0x2c   :  { %v60_v28 = vsub.f32 %v23_v0, %v59_v27  ;;  %v61_v29 = vsub.f32 %v24_v1, %v59_v27 }
  0x2e   :  { %v62_v30 = vmax.f32 %v60_v28, 0.0  ;;  %v63_v31 = vmax.f32 %v61_v29, 0.0 }
  0x30   :  { %64 = vst [vmem:[#allocation5] sm:$0xff] %v62_v30  ;;  %65 = vst [vmem:[#allocation5 + $0x8] sm:$0xff] %v63_v31 }
  0x31   :  { %126 = shalt.err (!%p123_p12)
}
  0x32   :  { %s127_s24 = scalar_lea.hbm %s187_s1, 256 }
  0x33   :  { %p128_p13 = scmp.ne.s32.totalorder %s187_s1, %s127_s24  ;;  %p131_p0 = scmp.lt.u32.totalorder %s127_s24, %s187_s1 }
  0x35   :  { %p133_p1 = pnand %p131_p0, %p128_p13 }
  0x37   :  { %136 = shalt.err (!%p133_p1)
}
  0x38   :  { %77 = dma.vmem_to_hbm [thread:$0]  %s72_s20, 256, %s187_s1, [#allocation4], %s142_s16, %s142_s16, %s143_s17  }
  0x39   :  { %139 = dma.done.wait [#allocation4], 256  }
  0x3a   :  { %140 = vsyncadd [#allocation4], 4294967040 }
  0x3b   :  { %81 = vsyncpa [#allocation3], 1 }
  0x3c   :  { %82 = vsyncpa [#allocation4], 1 }

</bundles_post_ra>
